<compile_context>
chip_gen: v5e
topology: v5e:2x2
jax: 0.10.0
libtpu: 0.0.40
codegen_flags: <defaults>
</compile_context>

<pallas_src>
import functools

import jax
import jax.numpy as jnp
from jax.experimental import pallas as pl
from jax.experimental.pallas import tpu as pltpu

LANE = 128          # vreg lane width
HIDDEN = 50         # logical hidden size of the PyTorch module
HIDDEN_PAD = 64     # zero-padded hidden size (full 8-sublane tiles, identical math)


def _round_up(n, m):
    return ((n + m - 1) // m) * m


def mlp_kernel(x_ref, w1_ref, b1_ref, w2_ref, b2_ref, w3_ref, b3_ref, o_ref,
               *, bf16_matmul=False):
    x = x_ref[...]                      # [d_in, Nt]
    w1 = w1_ref[...]                    # [H, d_in]

    # Layer 1: Linear(d_in -> H) + ReLU.
    if x_ref.shape[0] == 1:
        # K == 1: the "matmul" is an outer product -> pure VPU broadcast multiply,
        # no MXU round trip on the critical path.
        h1 = w1 * x                     # [H, 1] * [1, Nt] -> [H, Nt]
    else:
        h1 = jnp.dot(w1, x, preferred_element_type=jnp.float32)
    h1 = jnp.maximum(h1 + b1_ref[...], 0.0)

    # Layer 2: Linear(H -> H) + ReLU (MXU).
    w2 = w2_ref[...]
    if bf16_matmul:
        # f32 MXU matmuls decompose into multiple bf16 passes; bf16 inputs cut the
        # vmatmul count ~3x while keeping f32 accumulation.
        h2 = jnp.dot(w2.astype(jnp.bfloat16), h1.astype(jnp.bfloat16),
                     preferred_element_type=jnp.float32)
    else:
        h2 = jnp.dot(w2, h1, preferred_element_type=jnp.float32)
    h2 = jnp.maximum(h2 + b2_ref[...], 0.0)

    # Layer 3: Linear(H -> 1): VPU multiply + sublane (XLU) reduce, not an M=1 matmul.
    out = jnp.sum(h2 * w3_ref[...], axis=0, keepdims=True) + b3_ref[0, 0]
    o_ref[...] = out.astype(o_ref.dtype)   # [1, Nt] lane-dense store


def mlp_forward(x, params, *, grid_threshold=1024, tile_n=512, bf16_matmul=False):
    """x: [N, d_in] float32. params in padded [out, in] / column-bias layout.

    Returns [N, 1] float32 (same semantics as the PyTorch module's forward).
    Intended to be called under jit so the pad/reshape/slice plumbing fuses with
    the (overhead-bound) kernel.
    """
    N, d_in = x.shape
    H = params["w1"].shape[0]
    d_out = params["w3"].shape[1]       # 1
    assert d_out == 1, "layer-3 VPU reduce path assumes a single output feature"

    use_grid = N > grid_threshold
    N_pad = _round_up(N, tile_n if use_grid else LANE)

    # Features-major [d_in, N]; metadata-only reshape when d_in == 1.
    x_t = x.reshape(1, N) if d_in == 1 else x.T
    if N_pad != N:
        x_t = jnp.pad(x_t, ((0, 0), (0, N_pad - N)))

    kernel = functools.partial(mlp_kernel, bf16_matmul=bf16_matmul)
    vmem = lambda: pl.BlockSpec(memory_space=pltpu.MemorySpace.VMEM)
    smem = lambda: pl.BlockSpec(memory_space=pltpu.MemorySpace.SMEM)

    if not use_grid:
        # Entire problem (<~64 KB) is a single whole-array VMEM block: no per-step
        # pipeline overhead, no pointless double-buffering of invariant weights.
        out_t = pl.pallas_call(
            kernel,
            out_shape=jax.ShapeDtypeStruct((d_out, N_pad), jnp.float32),
            in_specs=[vmem(), vmem(), vmem(), vmem(), vmem(), vmem(), smem()],
            out_specs=vmem(),
        )(x_t, params["w1"], params["b1"], params["w2"], params["b2"],
          params["w3"], params["b3"])
    else:
        # Large-N path: 1-D parallel grid over the batch with `tile_n`-lane tiles;
        # weights stay VMEM-resident via constant index_maps so they are not
        # re-DMA'd per step. On v7x the parallel axis shards across both TCs.
        def const(shape):
            return pl.BlockSpec(shape, lambda i: (0, 0))

        out_t = pl.pallas_call(
            kernel,
            out_shape=jax.ShapeDtypeStruct((d_out, N_pad), jnp.float32),
            grid=(N_pad // tile_n,),
            in_specs=[
                pl.BlockSpec((d_in, tile_n), lambda i: (0, i)),       # x tile
                const((H, d_in)),                                     # w1
                const((H, 1)),                                        # b1
                const((H, H)),                                        # w2
                const((H, 1)),                                        # b2
                const((H, 1)),                                        # w3
                pl.BlockSpec((1, 1), lambda i: (0, 0),
                             memory_space=pltpu.MemorySpace.SMEM),    # b3 scalar
            ],
            out_specs=pl.BlockSpec((d_out, tile_n), lambda i: (0, i)),
            compiler_params=pltpu.CompilerParams(
                dimension_semantics=("parallel",)),
        )(x_t, params["w1"], params["b1"], params["w2"], params["b2"],
          params["w3"], params["b3"])

    # [1, N_pad] -> slice valid columns -> metadata-only reshape to [N, 1].
    return out_t[:, :N].reshape(N, 1)


def init_params(key, d_in, hidden=HIDDEN, hidden_pad=HIDDEN_PAD, d_out=1):
    """nn.Linear-style U(-1/sqrt(fan_in), 1/sqrt(fan_in)) init, stored directly in
    the kernel's [out, in] / column-bias layout, with the hidden dim zero-padded to
    `hidden_pad` so every tile is full (padding rows/cols are exact zeros, so the
    math is identical to the unpadded 50-unit MLP)."""
    ks = jax.random.split(key, 6)

    def lin(kw, kb, fan_in, fan_out):
        bound = 1.0 / float(fan_in) ** 0.5
        w = jax.random.uniform(kw, (fan_out, fan_in), jnp.float32, -bound, bound)
        b = jax.random.uniform(kb, (fan_out, 1), jnp.float32, -bound, bound)
        return w, b

    w1, b1 = lin(ks[0], ks[1], d_in, hidden)        # [50, d_in], [50, 1]
    w2, b2 = lin(ks[2], ks[3], hidden, hidden)      # [50, 50],   [50, 1]
    w3t, b3 = lin(ks[4], ks[5], hidden, d_out)      # [1, 50],    [1, 1]

    hp = hidden_pad
    return dict(
        w1=jnp.zeros((hp, d_in), jnp.float32).at[:hidden].set(w1),
        b1=jnp.zeros((hp, 1), jnp.float32).at[:hidden].set(b1),
        w2=jnp.zeros((hp, hp), jnp.float32).at[:hidden, :hidden].set(w2),
        b2=jnp.zeros((hp, 1), jnp.float32).at[:hidden].set(b2),
        w3=jnp.zeros((hp, 1), jnp.float32).at[:hidden].set(w3t.T),  # stored as [H, 1]
        b3=b3,
    )


def mlp_reference(x, p):
    """Pure-JAX reference in the batch-major view (zero padding is a no-op)."""
    h1 = jnp.maximum(x @ p["w1"].T + p["b1"].T, 0.0)
    h2 = jnp.maximum(h1 @ p["w2"].T + p["b2"].T, 0.0)
    return h2 @ p["w3"] + p["b3"]


if __name__ == "__main__":
    key = jax.random.PRNGKey(0)
    k_param, _ = jax.random.split(key)

    D_IN = 1        # matches the script's x = linspace(0, 1, 100).unsqueeze(-1)
    N = 100         # same number of points as the original script

    params = init_params(k_param, D_IN)
    x = jnp.linspace(0.0, 1.0, N, dtype=jnp.float32).reshape(N, D_IN)

    fwd = jax.jit(mlp_forward)

    # Small-N (gridless, single whole-array VMEM block) path.
    out = jax.block_until_ready(fwd(x, params))
    ref = mlp_reference(x, params)
    assert out.shape == (N, 1)
    assert jnp.allclose(out, ref, atol=1e-5, rtol=1e-5), "mismatch vs reference (N=100)"

    # Large-N (parallel batch grid, VMEM-resident weights) path.
    N_BIG = 2048
    x_big = jnp.linspace(0.0, 1.0, N_BIG, dtype=jnp.float32).reshape(N_BIG, D_IN)
    out_big = jax.block_until_ready(fwd(x_big, params))
    ref_big = mlp_reference(x_big, params)
    assert out_big.shape == (N_BIG, 1)
    assert jnp.allclose(out_big, ref_big, atol=1e-5, rtol=1e-5), "mismatch vs reference (N=2048)"

    print("KERNEL_OK")
</pallas_src>

<mosaic_0001>
module attributes {stable_mosaic.version = 11 : i64} {
  func.func @mlp_kernel(%arg0: memref<1x128xf32, #tpu.memory_space<vmem>>, %arg1: memref<64x1xf32, #tpu.memory_space<vmem>>, %arg2: memref<64x1xf32, #tpu.memory_space<vmem>>, %arg3: memref<64x64xf32, #tpu.memory_space<vmem>>, %arg4: memref<64x1xf32, #tpu.memory_space<vmem>>, %arg5: memref<64x1xf32, #tpu.memory_space<vmem>>, %arg6: memref<1x1xf32, #tpu.memory_space<smem>>, %arg7: memref<1x128xf32, #tpu.memory_space<vmem>>) attributes {dimension_semantics = [], scalar_prefetch = 0 : i64, scratch_operands = 0 : i64, tpu.core_type = #tpu.core_type<tc>} {
    %c0 = arith.constant 0 : index
    %c0_0 = arith.constant 0 : index
    %0 = vector.load %arg0[%c0, %c0_0] : memref<1x128xf32, #tpu.memory_space<vmem>>, vector<1x128xf32>
    %c0_1 = arith.constant 0 : index
    %c0_2 = arith.constant 0 : index
    %1 = vector.load %arg1[%c0_1, %c0_2] : memref<64x1xf32, #tpu.memory_space<vmem>>, vector<64x1xf32>
    %2 = vector.broadcast %1 : vector<64x1xf32> to vector<64x128xf32>
    %3 = vector.broadcast %0 : vector<1x128xf32> to vector<64x128xf32>
    %4 = arith.mulf %2, %3 : vector<64x128xf32>
    %c0_3 = arith.constant 0 : index
    %c0_4 = arith.constant 0 : index
    %5 = vector.load %arg2[%c0_3, %c0_4] : memref<64x1xf32, #tpu.memory_space<vmem>>, vector<64x1xf32>
    %6 = vector.broadcast %5 : vector<64x1xf32> to vector<64x128xf32>
    %7 = arith.addf %4, %6 : vector<64x128xf32>
    %cst = arith.constant 0.000000e+00 : f32
    %8 = vector.broadcast %cst : f32 to vector<64x128xf32>
    %9 = arith.maximumf %7, %8 : vector<64x128xf32>
    %c0_5 = arith.constant 0 : index
    %c0_6 = arith.constant 0 : index
    %10 = vector.load %arg3[%c0_5, %c0_6] : memref<64x64xf32, #tpu.memory_space<vmem>>, vector<64x64xf32>
    %cst_7 = arith.constant dense<0.000000e+00> : vector<64x128xf32>
    %11 = tpu.matmul %10, %9, %cst_7 {dimension_numbers = #tpu.dot_dimension_numbers<[1], [0], [0], [1], [0, 0, 1, 1], [], []>} : vector<64x64xf32>, vector<64x128xf32>, vector<64x128xf32> -> vector<64x128xf32>
    %c0_8 = arith.constant 0 : index
    %c0_9 = arith.constant 0 : index
    %12 = vector.load %arg4[%c0_8, %c0_9] : memref<64x1xf32, #tpu.memory_space<vmem>>, vector<64x1xf32>
    %13 = vector.broadcast %12 : vector<64x1xf32> to vector<64x128xf32>
    %14 = arith.addf %11, %13 : vector<64x128xf32>
    %cst_10 = arith.constant 0.000000e+00 : f32
    %15 = vector.broadcast %cst_10 : f32 to vector<64x128xf32>
    %16 = arith.maximumf %14, %15 : vector<64x128xf32>
    %c0_11 = arith.constant 0 : index
    %c0_12 = arith.constant 0 : index
    %17 = vector.load %arg5[%c0_11, %c0_12] : memref<64x1xf32, #tpu.memory_space<vmem>>, vector<64x1xf32>
    %18 = vector.broadcast %17 : vector<64x1xf32> to vector<64x128xf32>
    %19 = arith.mulf %16, %18 : vector<64x128xf32>
    %cst_13 = arith.constant dense<0.000000e+00> : vector<128xf32>
    %20 = vector.multi_reduction <add>, %19, %cst_13 [0] : vector<64x128xf32> to vector<128xf32>
    %21 = vector.shape_cast %20 : vector<128xf32> to vector<1x128xf32>
    %c0_14 = arith.constant 0 : index
    %c0_15 = arith.constant 0 : index
    %22 = memref.load %arg6[%c0_14, %c0_15] : memref<1x1xf32, #tpu.memory_space<smem>>
    %23 = vector.broadcast %22 : f32 to vector<1x128xf32>
    %24 = arith.addf %21, %23 : vector<1x128xf32>
    %c0_16 = arith.constant 0 : index
    %c0_17 = arith.constant 0 : index
    %25 = vector.load %arg7[%c0_16, %c0_17] : memref<1x128xf32, #tpu.memory_space<vmem>>, vector<1x128xf32>
    tpu.vector_store %arg7[%c0_16, %c0_17], %24 {strides = array<i32>} : memref<1x128xf32, #tpu.memory_space<vmem>>, vector<1x128xf32>,
    return
  }
}

</mosaic_0001>

<bundles_post_ra>
// kernel: mlp_forward.1
= control target key start
LH: loop header
LB: loop body
LE: loop exit
PB: predicated region body
PF: predicated region fallthrough
CT: control target
= control target key end

     0   :  { %v395_v0 = vmov 0   ;;  %vm207_vm0 = vcmask 523264   ;;  %s573_s2 = inlined_call_operand.vmem [shape: f32[64,1], index: 2, kind: input, shape index: {}]   ;;  %s574_s1 = inlined_call_operand.vmem [shape: f32[64,1], index: 1, kind: input, shape index: {}]   ;;  %s575_s0 = inlined_call_operand.vmem [shape: f32[1,128], index: 0, kind: input, shape index: {}]   ;;  %s576_s4 = inlined_call_operand.vmem [shape: f32[64,1], index: 4, kind: input, shape index: {}]   ;;  %s577_s5 = inlined_call_operand.vmem [shape: f32[64,1], index: 5, kind: input, shape index: {}]   ;;  %s578_s3 = inlined_call_operand.vmem [shape: f32[64,64], index: 3, kind: input, shape index: {}]   ;;  %s579_s6 = inlined_call_operand.<no memory space> [shape: f32[1,1], index: 6, kind: input, shape index: {}]   ;;  %s580_s7 = inlined_call_operand.vmem [shape: f32[1,128], index: 7, kind: output, shape index: {}]  }
   0x1   :  { %393 = vset.pattern.permute.xlu2 %v395_v0  ;;  %392 = vset.pattern.permute.xlu1 %v395_v0  ;;  %v94_v1 = vld [vmem:[%s573_s2 + $0x38] sm:$0xff]  ;;  %v93_v2 = vld [vmem:[%s573_s2 + $0x30] sm:$0xff]  ;;  %v33_v4 = vld [vmem:[%s574_s1 + $0x28] sm:$0xff] }
   0x2   :  { %v35_v3 = vld [vmem:[%s574_s1 + $0x38] sm:$0xff]  ;;  %391 = vset.pattern.permute.xlu0 %v395_v0  ;;  %132 = vperm.xlu1 %392, %v94_v1   ;;  %v34_v5 = vld [vmem:[%s574_s1 + $0x30] sm:$0xff]  ;;  %v32_v6 = vld [vmem:[%s574_s1 + $0x20] sm:$0xff] }
   0x3   :  { %127 = vperm.xlu2 %393, %v93_v2   ;;  %73 = vperm.xlu0 %391, %v35_v3   ;;  %v31_v7 = vld [vmem:[%s574_s1 + $0x18] sm:$0xff]  ;;  %v92_v8 = vld [vmem:[%s573_s2 + $0x28] sm:$0xff]  ;;  %v91_v9 = vld [vmem:[%s573_s2 + $0x20] sm:$0xff] }
   0x4   :  { %v90_v10 = vld [vmem:[%s573_s2 + $0x18] sm:$0xff]  ;;  %v30_v11 = vld [vmem:[%s574_s1 + $0x10] sm:$0xff]  ;;  %v29_v12 = vld [vmem:[%s574_s1 + $0x8] sm:$0xff] }
   0x5   :  { %v28_v13 = vld [vmem:[%s574_s1] sm:$0xff]  ;;  %v89_v14 = vld [vmem:[%s573_s2 + $0x10] sm:$0xff]  ;;  %v88_v15 = vld [vmem:[%s573_s2 + $0x8] sm:$0xff] }
   0x6   :  { %v159_v16 = vld [vmem:[%s576_s4] sm:$0xff]  ;;  %v160_v18 = vld [vmem:[%s576_s4 + $0x8] sm:$0xff]  ;;  %v162_v19 = vld [vmem:[%s576_s4 + $0x18] sm:$0xff] }
   0x7   :  { %v87_v17 = vld [vmem:[%s573_s2] sm:$0xff]  ;;  %v161_v20 = vld [vmem:[%s576_s4 + $0x10] sm:$0xff]  ;;  %v282_v22 = vld [vmem:[%s577_s5 + $0x8] sm:$0xff] }
   0x8   :  { %v163_v21 = vld [vmem:[%s576_s4 + $0x20] sm:$0xff]  ;;  %v283_v24 = vld [vmem:[%s577_s5 + $0x10] sm:$0xff]  ;;  %v284_v25 = vld [vmem:[%s577_s5 + $0x18] sm:$0xff] }
   0x9   :  { %v281_v23 = vld [vmem:[%s577_s5] sm:$0xff]  ;;  %v164_v26 = vld [vmem:[%s576_s4 + $0x28] sm:$0xff]  ;;  %v165_v27 = vld [vmem:[%s576_s4 + $0x30] sm:$0xff] }
   0xa   :  { %63 = vperm.xlu1 %392, %v33_v4   ;;  %v166_v28 = vld [vmem:[%s576_s4 + $0x38] sm:$0xff]  ;;  %v285_v29 = vld [vmem:[%s577_s5 + $0x20] sm:$0xff]  ;;  %v286_v30 = vld [vmem:[%s577_s5 + $0x28] sm:$0xff] }
   0xb   :  { %68 = vperm.xlu0 %391, %v34_v5   ;;  %58 = vperm.xlu2 %393, %v32_v6   ;;  %v288_v31 = vld [vmem:[%s577_s5 + $0x38] sm:$0xff]  ;;  %v287_v32 = vld [vmem:[%s577_s5 + $0x30] sm:$0xff]  ;;  %v394_v34 = vld [vmem:[%s575_s0] ss:$0 sm:$0xff] }
  0x12   :  { %53 = vperm.xlu1 %392, %v31_v7  }
  0x13   :  { %122 = vperm.xlu0 %391, %v92_v8   ;;  %117 = vperm.xlu2 %393, %v91_v9  }
  0x1a   :  { %112 = vperm.xlu1 %392, %v90_v10   ;;  %v151_v10 = vld [vmem:[%s578_s3] sm:$0xff] }
  0x1b   :  { %48 = vperm.xlu0 %391, %v30_v11   ;;  %43 = vperm.xlu2 %393, %v29_v12   ;;  %v153_v11 = vld [vmem:[%s578_s3 + $0x10] sm:$0xff]  ;;  %v155_v12 = vld [vmem:[%s578_s3 + $0x20] sm:$0xff] }
  0x22   :  { %38 = vperm.xlu1 %392, %v28_v13   ;;  %v157_v13 = vld [vmem:[%s578_s3 + $0x30] sm:$0xff] }
  0x23   :  { %107 = vperm.xlu0 %391, %v89_v14   ;;  %102 = vperm.xlu2 %393, %v88_v15   ;;  %v152_v14 = vld [vmem:[%s578_s3 + $0x8] sm:$0xff]  ;;  %v154_v15 = vld [vmem:[%s578_s3 + $0x18] sm:$0xff] }
  0x2a   :  { %169 = vperm.xlu1 %392, %v159_v16   ;;  %v156_v16 = vld [vmem:[%s578_s3 + $0x28] sm:$0xff] }
  0x2b   :  { %97 = vperm.xlu0 %391, %v87_v17   ;;  %174 = vperm.xlu2 %393, %v160_v18   ;;  %v158_v17 = vld [vmem:[%s578_s3 + $0x38] sm:$0xff] }
  0x32   :  { %184 = vperm.xlu1 %392, %v162_v19  }
  0x33   :  { %179 = vperm.xlu0 %391, %v161_v20   ;;  %189 = vperm.xlu2 %393, %v163_v21  }
  0x3a   :  { %296 = vperm.xlu1 %392, %v282_v22  }
  0x3b   :  { %291 = vperm.xlu0 %391, %v281_v23   ;;  %301 = vperm.xlu2 %393, %v283_v24  }
  0x42   :  { %306 = vperm.xlu1 %392, %v284_v25  }
  0x43   :  { %194 = vperm.xlu0 %391, %v164_v26   ;;  %199 = vperm.xlu2 %393, %v165_v27  }
  0x4a   :  { %204 = vperm.xlu1 %392, %v166_v28  }
  0x4b   :  { %311 = vperm.xlu0 %391, %v285_v29   ;;  %316 = vperm.xlu2 %393, %v286_v30  }
  0x52   :  { %326 = vperm.xlu1 %392, %v288_v31  }
  0x53   :  { %321 = vperm.xlu0 %391, %v287_v32  }
  0x5d   :  { %v128_v33 = vpop.permute.xlu2 %127 }
  0x65   :  { %v59_v36 = vpop.permute.xlu2 %58 }
  0x66   :  { %v83_v46 = vmul.f32 %v394_v34, %v59_v36 }
  0x6d   :  { %v118_v44 = vpop.permute.xlu2 %117 }
  0x6e   :  { %v139_v51 = vadd.f32 %v118_v44, %v83_v46 }
  0x70   :  { %v147_v55 = vmax.f32 %v139_v51, 0.0 }
  0x74   :  { %v133_v35 = vpop.permute.xlu1 %132 }
  0x75   :  { %v74_v37 = vpop.permute.xlu0 %73  ;;  %v44_v54 = vpop.permute.xlu2 %43 }
  0x76   :  { %v86_v38 = vmul.f32 %v394_v34, %v74_v37  ;;  %v80_v61 = vmul.f32 %v394_v34, %v44_v54 }
  0x78   :  { %v142_v39 = vadd.f32 %v133_v35, %v86_v38 }
  0x7a   :  { %v150_v40 = vmax.f32 %v142_v39, 0.0 }
  0x7c   :  { %240 = vmatpush.msra.mxu0 %v150_v40  ;;  %366 = vmatpush.msra.mxu1 %v150_v40  ;;  %v64_v41 = vpop.permute.xlu1 %63 }
  0x7d   :  { %367 = vmatpush.msra.mxu2 %v150_v40  ;;  %368 = vmatpush.msra.mxu3 %v150_v40  ;;  %v69_v42 = vpop.permute.xlu0 %68  ;;  %v84_v48 = vmul.f32 %v394_v34, %v64_v41  ;;  %v103_v62 = vpop.permute.xlu2 %102 }
  0x7e   :  { %v85_v43 = vmul.f32 %v394_v34, %v69_v42  ;;  %v136_v1 = vadd.f32 %v103_v62, %v80_v61 }
  0x80   :  { %v141_v45 = vadd.f32 %v128_v33, %v85_v43  ;;  %v144_v5 = vmax.f32 %v136_v1, 0.0 }
  0x82   :  { %v149_v47 = vmax.f32 %v141_v45, 0.0 }
  0x84   :  { %241 = vmatpush.msra.mxu0 %v149_v47  ;;  %369 = vmatpush.msra.mxu1 %v149_v47  ;;  %v54_v49 = vpop.permute.xlu1 %53 }
  0x85   :  { %370 = vmatpush.msra.mxu2 %v149_v47  ;;  %371 = vmatpush.msra.mxu3 %v149_v47  ;;  %v123_v50 = vpop.permute.xlu0 %122  ;;  %v82_v56 = vmul.f32 %v394_v34, %v54_v49  ;;  %v175_v19 = vpop.permute.xlu2 %174 }
  0x86   :  { %v140_v52 = vadd.f32 %v123_v50, %v84_v48 }
  0x88   :  { %v148_v53 = vmax.f32 %v140_v52, 0.0 }
  0x8a   :  { %242 = vmatpush.msra.mxu0 %v148_v53  ;;  %372 = vmatpush.msra.mxu1 %v148_v53 }
  0x8b   :  { %373 = vmatpush.msra.mxu2 %v148_v53  ;;  %374 = vmatpush.msra.mxu3 %v148_v53 }
  0x8c   :  { %243 = vmatpush.msra.mxu0 %v147_v55  ;;  %375 = vmatpush.msra.mxu1 %v147_v55  ;;  %v113_v57 = vpop.permute.xlu1 %112 }
  0x8d   :  { %376 = vmatpush.msra.mxu2 %v147_v55  ;;  %377 = vmatpush.msra.mxu3 %v147_v55  ;;  %v138_v58 = vadd.f32 %v113_v57, %v82_v56  ;;  %v49_v59 = vpop.permute.xlu0 %48  ;;  %v190_v22 = vpop.permute.xlu2 %189 }
  0x8e   :  { %v81_v63 = vmul.f32 %v394_v34, %v49_v59 }
  0x8f   :  { %v146_v60 = vmax.f32 %v138_v58, 0.0 }
  0x91   :  { %244 = vmatpush.msra.mxu0 %v146_v60  ;;  %378 = vmatpush.msra.mxu1 %v146_v60 }
  0x92   :  { %379 = vmatpush.msra.mxu2 %v146_v60  ;;  %380 = vmatpush.msra.mxu3 %v146_v60 }
  0x94   :  { %v39_v4 = vpop.permute.xlu1 %38 }
  0x95   :  { %v108_v0 = vpop.permute.xlu0 %107  ;;  %v79_v6 = vmul.f32 %v394_v34, %v39_v4  ;;  %v302_v25 = vpop.permute.xlu2 %301 }
  0x96   :  { %v137_v2 = vadd.f32 %v108_v0, %v81_v63 }
  0x98   :  { %v145_v3 = vmax.f32 %v137_v2, 0.0 }
  0x9a   :  { %245 = vmatpush.msra.mxu0 %v145_v3  ;;  %381 = vmatpush.msra.mxu1 %v145_v3 }
  0x9b   :  { %382 = vmatpush.msra.mxu2 %v145_v3  ;;  %383 = vmatpush.msra.mxu3 %v145_v3 }
  0x9c   :  { %246 = vmatpush.msra.mxu0 %v144_v5  ;;  %384 = vmatpush.msra.mxu1 %v144_v5  ;;  %v170_v18 = vpop.permute.xlu1 %169 }
  0x9d   :  { %385 = vmatpush.msra.mxu2 %v144_v5  ;;  %386 = vmatpush.msra.mxu3 %v144_v5  ;;  %v98_v7 = vpop.permute.xlu0 %97  ;;  %v200_v39 = vpop.permute.xlu2 %199 }
  0x9e   :  { %v135_v8 = vadd.f32 %v98_v7, %v79_v6 }
  0xa0   :  { %v143_v9 = vmax.f32 %v135_v8, 0.0 }
  0xa2   :  { %247 = vmatpush.msra.mxu0 %v143_v9  ;;  %387 = vmatpush.msra.mxu1 %v143_v9 }
  0xa3   :  { %388 = vmatpush.msra.mxu2 %v143_v9  ;;  %389 = vmatpush.msra.mxu3 %v143_v9 }
  0xa4   :  { %358 = vmatmul.msk.f32.vlgmr.msra.gmra.mxu0 %vm207_vm0, %v151_v10  ;;  %360 = vmatmul.msk.f32.vlgmr.msra.gmra.mxu1 %vm207_vm0, %v153_v11  ;;  %v185_v21 = vpop.permute.xlu1 %184 }
  0xa5   :  { %362 = vmatmul.msk.f32.vlgmr.msra.gmra.mxu2 %vm207_vm0, %v155_v12  ;;  %364 = vmatmul.msk.f32.vlgmr.msra.gmra.mxu3 %vm207_vm0, %v157_v13  ;;  %v180_v20 = vpop.permute.xlu0 %179  ;;  %v317_v62 = vpop.permute.xlu2 %316 }
  0xac   :  { %359 = vmatmul.msk.f32.gmra.mxu0 %vm207_vm0, %v152_v14  ;;  %361 = vmatmul.msk.f32.gmra.mxu1 %vm207_vm0, %v154_v15  ;;  %v297_v24 = vpop.permute.xlu1 %296  ;;  %v351_v14 = vstv %s579_s6 }
  0xad   :  { %363 = vmatmul.msk.f32.gmra.mxu2 %vm207_vm0, %v156_v16  ;;  %365 = vmatmul.msk.f32.gmra.mxu3 %vm207_vm0, %v158_v17  ;;  %v292_v23 = vpop.permute.xlu0 %291 }
  0xb4   :  { %v307_v29 = vpop.permute.xlu1 %306 }
  0xb5   :  { %v195_v28 = vpop.permute.xlu0 %194 }
  0xbc   :  { %v205_v47 = vpop.permute.xlu1 %204 }
  0xbd   :  { %v312_v43 = vpop.permute.xlu0 %311 }
  0xc4   :  { %v327_v5 = vpop.permute.xlu1 %326 }
  0xc5   :  { %v322_v2 = vpop.permute.xlu0 %321 }
 0x121   :  { %v249_v26 = vpop.f32.mrf.mxu0  ;;  %v255_v27 = vpop.f32.mrf.mxu1 }
 0x122   :  { %v250_v30 = vadd.f32 %v249_v26, %v170_v18  ;;  %v256_v31 = vadd.f32 %v255_v27, %v180_v20 }
 0x124   :  { %v273_v36 = vmax.f32 %v250_v30, 0.0  ;;  %v275_v40 = vmax.f32 %v256_v31, 0.0 }
 0x126   :  { %v329_v44 = vmul.f32 %v292_v23, %v273_v36  ;;  %v331_v48 = vmul.f32 %v302_v25, %v275_v40 }
 0x128   :  { %v261_v32 = vpop.f32.mrf.mxu2  ;;  %v267_v33 = vpop.f32.mrf.mxu3 }
 0x129   :  { %v252_v34 = vpop.f32.mrf.mxu0  ;;  %v258_v35 = vpop.f32.mrf.mxu1  ;;  %v262_v41 = vadd.f32 %v261_v32, %v190_v22  ;;  %v268_v50 = vadd.f32 %v267_v33, %v200_v39 }
 0x12a   :  { %v253_v37 = vadd.f32 %v252_v34, %v175_v19  ;;  %v259_v38 = vadd.f32 %v258_v35, %v185_v21 }
 0x12b   :  { %v277_v49 = vmax.f32 %v262_v41, 0.0  ;;  %v279_v60 = vmax.f32 %v268_v50, 0.0 }
 0x12c   :  { %v274_v42 = vmax.f32 %v253_v37, 0.0  ;;  %v276_v46 = vmax.f32 %v259_v38, 0.0 }
 0x12d   :  { %v333_v59 = vmul.f32 %v312_v43, %v277_v49  ;;  %v335_v3 = vmul.f32 %v322_v2, %v279_v60 }
 0x12e   :  { %v330_v45 = vmul.f32 %v297_v24, %v274_v42  ;;  %v332_v55 = vmul.f32 %v307_v29, %v276_v46 }
 0x130   :  { %v337_v51 = vadd.f32 %v330_v45, %v329_v44  ;;  %v264_v52 = vpop.f32.mrf.mxu2  ;;  %v270_v53 = vpop.f32.mrf.mxu3 }
 0x131   :  { %v265_v54 = vadd.f32 %v264_v52, %v195_v28  ;;  %v271_v57 = vadd.f32 %v270_v53, %v205_v47 }
 0x132   :  { %v338_v56 = vadd.f32 %v337_v51, %v331_v48 }
 0x133   :  { %v278_v58 = vmax.f32 %v265_v54, 0.0  ;;  %v280_v1 = vmax.f32 %v271_v57, 0.0 }
 0x134   :  { %v339_v61 = vadd.f32 %v338_v56, %v332_v55 }
 0x135   :  { %v334_v63 = vmul.f32 %v317_v62, %v278_v58  ;;  %v336_v6 = vmul.f32 %v327_v5, %v280_v1 }
 0x136   :  { %v340_v0 = vadd.f32 %v339_v61, %v333_v59 }
 0x138   :  { %v341_v4 = vadd.f32 %v340_v0, %v334_v63 }
 0x13a   :  { %v342_v7 = vadd.f32 %v341_v4, %v335_v3 }
 0x13c   :  { %v343_v8 = vadd.f32 %v342_v7, %v336_v6 }
 0x13e   :  { %v344_v9 = vrot.slane %v343_v8, 4 }
 0x140   :  { %v345_v10 = vadd.f32 %v344_v9, %v343_v8 }
 0x142   :  { %v346_v11 = vrot.slane %v345_v10, 2 }
 0x144   :  { %v347_v12 = vadd.f32 %v346_v11, %v345_v10 }
 0x146   :  { %v348_v13 = vrot.slane %v347_v12, 1 }
 0x148   :  { %v349_v15 = vadd.f32 %v348_v13, %v347_v12 }
 0x14a   :  { %v352_v16 = vadd.f32 %v351_v14, %v349_v15 }
 0x14c   :  { %353 = vst [vmem:[%s580_s7] sm:$0x1] %v352_v16 }

</bundles_post_ra>
